<compile_context>
chip_gen: v5e
topology: v5e:2x2
jax: 0.10.0
libtpu: 0.0.40
codegen_flags: <defaults>
</compile_context>

<pallas_src>
import functools

import jax
import jax.numpy as jnp
from jax.experimental import pallas as pl
from jax.experimental.pallas import tpu as pltpu

_LANE = 128


def _round_up(n, m):
    return ((n + m - 1) // m) * m


def _pad_feature_dim(d):
    """Lane-dense padding: multiple of 128; prefer a 256-multiple (v6e/v7x MXU width)
    when it costs <= 12.5% extra."""
    d128 = _round_up(max(d, _LANE), _LANE)
    if d >= 256 and d128 % 256 != 0 and (_round_up(d, 256) - d) * 8 <= d:
        return _round_up(d, 256)
    return d128


def _vmem_capacity_bytes():
    try:
        return int(pltpu.get_tpu_info().vmem_capacity_bytes)
    except Exception:
        return 64 * 1024 * 1024  # conservative (v7x per-TC)


# --------------------------------------------------------------------------------------
# Fused single-kernel path: all padded (W_i, b_i) resident in VMEM, batch tiled on grid.
# --------------------------------------------------------------------------------------
def _mlp_fused_kernel(x_ref, *rest, num_layers, act_dtype):
    """rest = w0, b0, ..., w_{L-1}, b_{L-1}, o_ref. Activations never leave VMEM."""
    o_ref = rest[-1]
    wb = rest[:-1]
    h = x_ref[...]                                   # (tile_b, din_pad), act_dtype
    for i in range(num_layers):
        w = wb[2 * i][...]                           # (din_pad_i, dout_pad_i), compute dtype
        b = wb[2 * i + 1][...]                       # (1, dout_pad_i), f32
        y = jnp.dot(h, w, preferred_element_type=jnp.float32) + b
        if i < num_layers - 1:
            # Keep the live intermediate in the compute dtype (bf16 path halves vreg/VMEM).
            h = jnp.maximum(y, 0.0).astype(act_dtype)
        else:
            h = y
    o_ref[...] = h.astype(o_ref.dtype)


# --------------------------------------------------------------------------------------
# Streamed fallback path: per-layer K/N-tiled matmul with f32 accumulator scratch.
# --------------------------------------------------------------------------------------
def _linear_tiled_kernel(x_ref, w_ref, b_ref, o_ref, acc_ref, *, apply_relu):
    k = pl.program_id(2)

    @pl.when(k == 0)
    def _():
        acc_ref[...] = jnp.zeros_like(acc_ref)

    acc_ref[...] += jnp.dot(x_ref[...], w_ref[...],
                            preferred_element_type=jnp.float32)

    @pl.when(k == pl.num_programs(2) - 1)
    def _():
        y = acc_ref[...] + b_ref[...]
        if apply_relu:
            y = jnp.maximum(y, 0.0)
        o_ref[...] = y.astype(o_ref.dtype)


def _choose_tile(dim, max_tile):
    """Largest multiple of 128 dividing `dim` and <= max_tile (dims are 128-padded)."""
    best = _LANE
    t = _LANE
    while t <= min(dim, max_tile):
        if dim % t == 0:
            best = t
        t += _LANE
    return best


def _linear_layer(x, w, b, *, apply_relu, out_dtype, tm):
    m, k_dim = x.shape
    _, n = w.shape
    tk = _choose_tile(k_dim, 512)
    tn = _choose_tile(n, 512)

    fp = (2 * tm * (tk * x.dtype.itemsize + tn * jnp.dtype(out_dtype).itemsize)
          + 2 * (tk * tn * w.dtype.itemsize + tn * 4)
          + tm * tn * 4)
    vmem_limit = min(_vmem_capacity_bytes(), max(32 * 1024 * 1024, int(2 * fp)))

    kernel = functools.partial(_linear_tiled_kernel, apply_relu=apply_relu)
    return pl.pallas_call(
        kernel,
        out_shape=jax.ShapeDtypeStruct((m, n), out_dtype),
        grid=(m // tm, n // tn, k_dim // tk),
        in_specs=[pl.BlockSpec((tm, tk), lambda i, j, k: (i, k)),
                  pl.BlockSpec((tk, tn), lambda i, j, k: (k, j)),
                  pl.BlockSpec((1, tn), lambda i, j, k: (0, j))],
        out_specs=pl.BlockSpec((tm, tn), lambda i, j, k: (i, j)),
        scratch_shapes=[pltpu.VMEM((tm, tn), jnp.float32)],
        compiler_params=pltpu.CompilerParams(
            dimension_semantics=("parallel", "parallel", "arbitrary"),
            vmem_limit_bytes=vmem_limit),
        cost_estimate=pl.CostEstimate(
            flops=2 * m * k_dim * n, transcendentals=0,
            bytes_accessed=(m * k_dim * x.dtype.itemsize
                            + k_dim * n * w.dtype.itemsize
                            + n * 4
                            + m * n * jnp.dtype(out_dtype).itemsize)),
    )(x, w, b)


# --------------------------------------------------------------------------------------
# Wrapper
# --------------------------------------------------------------------------------------
def prepare_params(params, compute_dtype=jnp.bfloat16):
    """Zero-pad (w, b) so every feature dim is lane-dense. Weights in compute dtype
    (bf16 default, MXU-native); biases kept in f32 (tiny, no per-tile cast). Padding is
    exact: zero rows/cols/bias leave the valid outputs unchanged."""
    padded = []
    for w, b in params:
        din, dout = w.shape
        din_p = _pad_feature_dim(din)
        dout_p = _pad_feature_dim(dout)
        wp = jnp.zeros((din_p, dout_p), compute_dtype).at[:din, :dout].set(
            w.astype(compute_dtype))
        bp = jnp.zeros((1, dout_p), jnp.float32).at[0, :dout].set(
            b.astype(jnp.float32))
        padded.append((wp, bp))
    return padded


def _mlp_forward_impl(x, padded_params, *, out_dim, vmem_budget_bytes=None,
                      force_tiled=False):
    B, din = x.shape
    num_layers = len(padded_params)
    compute_dtype = padded_params[0][0].dtype
    act_dtype = compute_dtype                      # activations in the MXU input dtype
    din_pad = padded_params[0][0].shape[0]
    dout_pad = padded_params[-1][0].shape[1]
    out_dtype = x.dtype

    cap = _vmem_capacity_bytes()
    budget = vmem_budget_bytes if vmem_budget_bytes is not None else int(cap * 0.8)

    act_isz = jnp.dtype(act_dtype).itemsize
    out_isz = jnp.dtype(out_dtype).itemsize
    pack = 32 // act_isz                           # sublane packing: f32 -> 8, bf16 -> 16

    resident = sum(int(w.size) * w.dtype.itemsize + int(b.size) * b.dtype.itemsize
                   for w, b in padded_params)      # single-buffered (Buffered(1))
    widest = max([din_pad] + [w.shape[1] for w, _ in padded_params])

    def fused_footprint(tb):
        stream = 2 * tb * (din_pad * act_isz + dout_pad * out_isz)  # double-buffered x/out
        live = 2 * tb * widest * (4 + act_isz)                       # f32 acc + act copy
        return resident + stream + live

    # Largest batch tile (multiple of the sublane pack) that keeps the fused kernel
    # inside the per-core VMEM budget.
    tile_b = None
    if not force_tiled:
        c = _round_up(min(512, _round_up(B, pack)), pack)
        while c >= pack:
            if fused_footprint(c) <= budget:
                tile_b = c
                break
            c -= pack

    if tile_b is None:
        # ---- streamed fallback: per-layer K/N-tiled matmuls, activations via HBM ----
        tm = min(256, _round_up(B, pack))
        b_pad = _round_up(B, tm)
        h = x.astype(act_dtype)
        if b_pad != B or din_pad != din:
            h = jnp.zeros((b_pad, din_pad), act_dtype).at[:B, :din].set(h)
        for i, (w, bias) in enumerate(padded_params):
            last = i == num_layers - 1
            h = _linear_layer(h, w, bias, apply_relu=not last,
                              out_dtype=out_dtype if last else act_dtype, tm=tm)
        if b_pad == B and dout_pad == out_dim:
            return h
        return h[:B, :out_dim]

    # ---- fused path ----
    b_pad = _round_up(B, tile_b)
    x_c = x.astype(act_dtype)
    if b_pad != B or din_pad != din:               # skip the padded copy when aligned
        x_c = jnp.zeros((b_pad, din_pad), act_dtype).at[:B, :din].set(x_c)

    in_specs = [pl.BlockSpec((tile_b, din_pad), lambda i: (i, 0))]
    flat_params = []
    for w, bias in padded_params:
        kin, kout = w.shape
        # Constant block index -> resident across the grid; single-buffered because the
        # block never changes (default double buffering would be pure VMEM waste).
        in_specs.append(pl.BlockSpec((kin, kout), lambda i: (0, 0),
                                     pipeline_mode=pl.Buffered(1)))
        in_specs.append(pl.BlockSpec((1, kout), lambda i: (0, 0),
                                     pipeline_mode=pl.Buffered(1)))
        flat_params += [w, bias]

    flops = 2 * b_pad * sum(w.shape[0] * w.shape[1] for w, _ in padded_params)
    bytes_accessed = int(x_c.size) * act_isz + resident + b_pad * dout_pad * out_isz
    vmem_limit = min(cap, max(32 * 1024 * 1024,
                              int(1.25 * fused_footprint(tile_b)) + (4 << 20)))

    kernel = functools.partial(_mlp_fused_kernel, num_layers=num_layers,
                               act_dtype=act_dtype)
    out_pad = pl.pallas_call(
        kernel,
        out_shape=jax.ShapeDtypeStruct((b_pad, dout_pad), out_dtype),
        grid=(b_pad // tile_b,),
        in_specs=in_specs,
        out_specs=pl.BlockSpec((tile_b, dout_pad), lambda i: (i, 0)),
        compiler_params=pltpu.CompilerParams(
            dimension_semantics=("parallel",),
            vmem_limit_bytes=vmem_limit),
        cost_estimate=pl.CostEstimate(flops=flops, transcendentals=0,
                                      bytes_accessed=bytes_accessed),
    )(x_c, *flat_params)

    if b_pad == B and dout_pad == out_dim:
        return out_pad
    return out_pad[:B, :out_dim]


mlp_forward = jax.jit(_mlp_forward_impl,
                      static_argnames=("out_dim", "vmem_budget_bytes", "force_tiled"))


# --------------------------------------------------------------------------------------
# Reference / init
# --------------------------------------------------------------------------------------
def init_mlp_params(key, input_dim, hidden_dim, output_dim, num_layers):
    """Deterministic init mirroring the layer shapes of the PyTorch MLP."""
    h = [hidden_dim] * (num_layers - 1)
    dims = list(zip([input_dim] + h, h + [output_dim]))
    params = []
    for (n, k) in dims:
        key, kw, kb = jax.random.split(key, 3)
        bound = 1.0 / jnp.sqrt(jnp.float32(n))
        w = jax.random.uniform(kw, (n, k), jnp.float32, -bound, bound)
        b = jax.random.uniform(kb, (k,), jnp.float32, -bound, bound)
        params.append((w, b))
    return params


def mlp_reference(x, params):
    num_layers = len(params)
    for i, (w, b) in enumerate(params):
        x = x @ w + b
        if i < num_layers - 1:
            x = jnp.maximum(x, 0.0)
    return x


if __name__ == "__main__":
    key = jax.random.PRNGKey(0)
    k_x, k_p = jax.random.split(key)

    batch = 8
    input_dim, hidden_dim, output_dim, num_layers = 16, 32, 4, 3

    x = jax.random.normal(k_x, (batch, input_dim), dtype=jnp.float32)
    params = init_mlp_params(k_p, input_dim, hidden_dim, output_dim, num_layers)
    ref = mlp_reference(x, params)

    # Default bf16 MXU-native fused path (bf16 weights/activations, f32 accumulation).
    params_bf16 = prepare_params(params)
    out_bf16 = jax.block_until_ready(mlp_forward(x, params_bf16, out_dim=output_dim))
    assert out_bf16.shape == (batch, output_dim)
    assert jnp.allclose(out_bf16, ref, atol=5e-2, rtol=5e-2)

    # Full-precision fused path (tight tolerance; MXU f32 is multi-pass, not bit-exact).
    params_f32 = prepare_params(params, jnp.float32)
    out_f32 = jax.block_until_ready(mlp_forward(x, params_f32, out_dim=output_dim))
    assert out_f32.shape == (batch, output_dim)
    assert jnp.allclose(out_f32, ref, atol=1e-5, rtol=1e-5)

    # Streamed K/N-tiled fallback (used automatically when the resident weights exceed
    # the per-core VMEM budget); forced here to exercise the path.
    out_tiled = jax.block_until_ready(
        mlp_forward(x, params_bf16, out_dim=output_dim, force_tiled=True))
    assert out_tiled.shape == (batch, output_dim)
    assert jnp.allclose(out_tiled, ref, atol=5e-2, rtol=5e-2)

    print("KERNEL_OK")
</pallas_src>

<mosaic_0001>
module attributes {stable_mosaic.version = 11 : i64} {
  func.func @_mlp_fused_kernel(%arg0: i32, %arg1: memref<16x128xbf16, #tpu.memory_space<vmem>>, %arg2: memref<128x128xbf16, #tpu.memory_space<vmem>>, %arg3: memref<1x128xf32, #tpu.memory_space<vmem>>, %arg4: memref<128x128xbf16, #tpu.memory_space<vmem>>, %arg5: memref<1x128xf32, #tpu.memory_space<vmem>>, %arg6: memref<128x128xbf16, #tpu.memory_space<vmem>>, %arg7: memref<1x128xf32, #tpu.memory_space<vmem>>, %arg8: memref<16x128xf32, #tpu.memory_space<vmem>>) attributes {dimension_semantics = [#tpu.dimension_semantics<parallel>], iteration_bounds = array<i64: 1>, scalar_prefetch = 0 : i64, scratch_operands = 0 : i64, tpu.core_type = #tpu.core_type<tc>, window_params = [{transform_indices = @transform_0, window_bounds = array<i64: 16, 128>}, {pipeline_mode = #tpu.pipeline_mode<synchronous>, transform_indices = @transform_1, window_bounds = array<i64: 128, 128>}, {pipeline_mode = #tpu.pipeline_mode<synchronous>, transform_indices = @transform_2, window_bounds = array<i64: 1, 128>}, {pipeline_mode = #tpu.pipeline_mode<synchronous>, transform_indices = @transform_3, window_bounds = array<i64: 128, 128>}, {pipeline_mode = #tpu.pipeline_mode<synchronous>, transform_indices = @transform_4, window_bounds = array<i64: 1, 128>}, {pipeline_mode = #tpu.pipeline_mode<synchronous>, transform_indices = @transform_5, window_bounds = array<i64: 128, 128>}, {pipeline_mode = #tpu.pipeline_mode<synchronous>, transform_indices = @transform_6, window_bounds = array<i64: 1, 128>}, {transform_indices = @transform_7, window_bounds = array<i64: 16, 128>}]} {
    %c0 = arith.constant 0 : index
    %c0_0 = arith.constant 0 : index
    %0 = vector.load %arg1[%c0, %c0_0] : memref<16x128xbf16, #tpu.memory_space<vmem>>, vector<16x128xbf16>
    %c0_1 = arith.constant 0 : index
    %c0_2 = arith.constant 0 : index
    %1 = vector.load %arg2[%c0_1, %c0_2] : memref<128x128xbf16, #tpu.memory_space<vmem>>, vector<128x128xbf16>
    %c0_3 = arith.constant 0 : index
    %c0_4 = arith.constant 0 : index
    %2 = vector.load %arg3[%c0_3, %c0_4] : memref<1x128xf32, #tpu.memory_space<vmem>>, vector<1x128xf32>
    %cst = arith.constant dense<0.000000e+00> : vector<16x128xf32>
    %3 = tpu.matmul %0, %1, %cst {dimension_numbers = #tpu.dot_dimension_numbers<[1], [0], [0], [1], [0, 0, 1, 1], [], []>} : vector<16x128xbf16>, vector<128x128xbf16>, vector<16x128xf32> -> vector<16x128xf32>
    %4 = vector.broadcast %2 : vector<1x128xf32> to vector<16x128xf32>
    %5 = arith.addf %3, %4 : vector<16x128xf32>
    %cst_5 = arith.constant 0.000000e+00 : f32
    %6 = vector.broadcast %cst_5 : f32 to vector<16x128xf32>
    %7 = arith.maximumf %5, %6 : vector<16x128xf32>
    %8 = arith.truncf %7 : vector<16x128xf32> to vector<16x128xbf16>
    %c0_6 = arith.constant 0 : index
    %c0_7 = arith.constant 0 : index
    %9 = vector.load %arg4[%c0_6, %c0_7] : memref<128x128xbf16, #tpu.memory_space<vmem>>, vector<128x128xbf16>
    %c0_8 = arith.constant 0 : index
    %c0_9 = arith.constant 0 : index
    %10 = vector.load %arg5[%c0_8, %c0_9] : memref<1x128xf32, #tpu.memory_space<vmem>>, vector<1x128xf32>
    %cst_10 = arith.constant dense<0.000000e+00> : vector<16x128xf32>
    %11 = tpu.matmul %8, %9, %cst_10 {dimension_numbers = #tpu.dot_dimension_numbers<[1], [0], [0], [1], [0, 0, 1, 1], [], []>} : vector<16x128xbf16>, vector<128x128xbf16>, vector<16x128xf32> -> vector<16x128xf32>
    %12 = vector.broadcast %10 : vector<1x128xf32> to vector<16x128xf32>
    %13 = arith.addf %11, %12 : vector<16x128xf32>
    %cst_11 = arith.constant 0.000000e+00 : f32
    %14 = vector.broadcast %cst_11 : f32 to vector<16x128xf32>
    %15 = arith.maximumf %13, %14 : vector<16x128xf32>
    %16 = arith.truncf %15 : vector<16x128xf32> to vector<16x128xbf16>
    %c0_12 = arith.constant 0 : index
    %c0_13 = arith.constant 0 : index
    %17 = vector.load %arg6[%c0_12, %c0_13] : memref<128x128xbf16, #tpu.memory_space<vmem>>, vector<128x128xbf16>
    %c0_14 = arith.constant 0 : index
    %c0_15 = arith.constant 0 : index
    %18 = vector.load %arg7[%c0_14, %c0_15] : memref<1x128xf32, #tpu.memory_space<vmem>>, vector<1x128xf32>
    %cst_16 = arith.constant dense<0.000000e+00> : vector<16x128xf32>
    %19 = tpu.matmul %16, %17, %cst_16 {dimension_numbers = #tpu.dot_dimension_numbers<[1], [0], [0], [1], [0, 0, 1, 1], [], []>} : vector<16x128xbf16>, vector<128x128xbf16>, vector<16x128xf32> -> vector<16x128xf32>
    %20 = vector.broadcast %18 : vector<1x128xf32> to vector<16x128xf32>
    %21 = arith.addf %19, %20 : vector<16x128xf32>
    %c0_17 = arith.constant 0 : index
    %c0_18 = arith.constant 0 : index
    %22 = vector.load %arg8[%c0_17, %c0_18] : memref<16x128xf32, #tpu.memory_space<vmem>>, vector<16x128xf32>
    tpu.vector_store %arg8[%c0_17, %c0_18], %21 {strides = array<i32>} : memref<16x128xf32, #tpu.memory_space<vmem>>, vector<16x128xf32>,
    return
  }
  func.func @transform_0(%arg0: i32) -> (i32, i32) {
    %c0_i32 = arith.constant 0 : i32
    %c0_i32_0 = arith.constant 0 : i32
    return %arg0, %c0_i32 : i32, i32
  }
  func.func @transform_1(%arg0: i32) -> (i32, i32) {
    %c0_i32 = arith.constant 0 : i32
    %c0_i32_0 = arith.constant 0 : i32
    %c0_i32_1 = arith.constant 0 : i32
    return %c0_i32, %c0_i32_0 : i32, i32
  }
  func.func @transform_2(%arg0: i32) -> (i32, i32) {
    %c0_i32 = arith.constant 0 : i32
    %c0_i32_0 = arith.constant 0 : i32
    %c0_i32_1 = arith.constant 0 : i32
    return %c0_i32, %c0_i32_0 : i32, i32
  }
  func.func @transform_3(%arg0: i32) -> (i32, i32) {
    %c0_i32 = arith.constant 0 : i32
    %c0_i32_0 = arith.constant 0 : i32
    %c0_i32_1 = arith.constant 0 : i32
    return %c0_i32, %c0_i32_0 : i32, i32
  }
  func.func @transform_4(%arg0: i32) -> (i32, i32) {
    %c0_i32 = arith.constant 0 : i32
    %c0_i32_0 = arith.constant 0 : i32
    %c0_i32_1 = arith.constant 0 : i32
    return %c0_i32, %c0_i32_0 : i32, i32
  }
  func.func @transform_5(%arg0: i32) -> (i32, i32) {
    %c0_i32 = arith.constant 0 : i32
    %c0_i32_0 = arith.constant 0 : i32
    %c0_i32_1 = arith.constant 0 : i32
    return %c0_i32, %c0_i32_0 : i32, i32
  }
  func.func @transform_6(%arg0: i32) -> (i32, i32) {
    %c0_i32 = arith.constant 0 : i32
    %c0_i32_0 = arith.constant 0 : i32
    %c0_i32_1 = arith.constant 0 : i32
    return %c0_i32, %c0_i32_0 : i32, i32
  }
  func.func @transform_7(%arg0: i32) -> (i32, i32) {
    %c0_i32 = arith.constant 0 : i32
    %c0_i32_0 = arith.constant 0 : i32
    return %arg0, %c0_i32 : i32, i32
  }
}

</mosaic_0001>

<bundles_post_ra>
// kernel: _mlp_forward_impl.1
= control target key start
LH: loop header
LB: loop body
LE: loop exit
PB: predicated region body
PF: predicated region fallthrough
CT: control target
= control target key end

     0   :  { %12 = vsyncpa [#allocation3], 0  ;;  %s622_s0 = inlined_call_operand.vmem [shape: bf16[16,128], index: 0, kind: input, shape index: {}]   ;;  %s623_s1 = inlined_call_operand.hbm [shape: bf16[128,128], index: 1, kind: input, shape index: {}]   ;;  %s624_s2 = inlined_call_operand.vmem [shape: f32[1,128], index: 2, kind: input, shape index: {}]   ;;  %s625_s3 = inlined_call_operand.hbm [shape: bf16[128,128], index: 3, kind: input, shape index: {}]   ;;  %s626_s4 = inlined_call_operand.vmem [shape: f32[1,128], index: 4, kind: input, shape index: {}]   ;;  %s627_s5 = inlined_call_operand.hbm [shape: bf16[128,128], index: 5, kind: input, shape index: {}]   ;;  %s628_s6 = inlined_call_operand.vmem [shape: f32[1,128], index: 6, kind: input, shape index: {}]   ;;  %s629_s7 = inlined_call_operand.vmem [shape: f32[16,128], index: 7, kind: output, shape index: {}]  }
   0x1   :  { %13 = vsyncpa [#allocation5], 0  ;;  %s35_s26 = sshll.u32 %s625_s3, 4  ;;  %s550_s27 = smov [#allocation4]   ;;  %s36_s26 = int_to_ptr.hbm [resolvable:$true] %s35_s26 }
   0x2   :  { %s37_s28 = sshll.u32 %s550_s27, 4  ;;  %s20_s8 = sshll.u32 %s623_s1, 4  ;;  %s38_s28 = int_to_ptr.vmem [resolvable:$true] %s37_s28  ;;  %s21_s8 = int_to_ptr.hbm [resolvable:$true] %s20_s8 }
   0x3   :  { %s551_s9 = smov 64   ;;  %s552_s10 = smov 4  }
   0x4   :  { %43 = dma.hbm_to_vmem [thread:$0]  %s36_s26, 1024, %s38_s28, [#allocation5], %s551_s9, %s551_s9, %s552_s10  }
   0x5   :  { %s553_s11 = smov [#allocation2]   ;;  %s50_s15 = sshll.u32 %s627_s5, 4  ;;  %s51_s15 = int_to_ptr.hbm [resolvable:$true] %s50_s15 }
   0x6   :  { %s22_s12 = sshll.u32 %s553_s11, 4  ;;  %s554_s3 = smov [#allocation6]   ;;  %s23_s12 = int_to_ptr.vmem [resolvable:$true] %s22_s12 }
   0x7   :  { %28 = dma.hbm_to_vmem [thread:$0]  %s21_s8, 1024, %s23_s12, [#allocation3], %s551_s9, %s551_s9, %s552_s10  }
   0x8   :  { %s52_s16 = sshll.u32 %s554_s3, 4  ;;  %s53_s16 = int_to_ptr.vmem [resolvable:$true] %s52_s16 }
   0x9   :  { %58 = dma.hbm_to_vmem [thread:$0]  %s51_s15, 1024, %s53_s16, [#allocation5], %s551_s9, %s551_s9, %s552_s10  }
   0xa   :  { %546 = dma.done.wait [#allocation3], 1024  }
   0xb   :  { %547 = vsyncadd [#allocation3], 4294966272 }
   0xc   :  { %548 = dma.done.wait [#allocation5], 2048  }
   0xd   :  { %549 = vsyncadd [#allocation5], 4294965248  ;;  %v449_v0 = vld [vmem:[#allocation2 + $0x38] sm:$0xff]  ;;  %v448_v1 = vld [vmem:[#allocation2 + $0x30] sm:$0xff] }
   0xe   :  { %149 = vmatpush.bf16.msra.mxu0 %v449_v0  ;;  %v457_v2 = vld [vmem:[#allocation4 + $0x38] sm:$0xff]  ;;  %v456_v3 = vld [vmem:[#allocation4 + $0x30] sm:$0xff]  ;;  %v447_v4 = vld [vmem:[#allocation2 + $0x28] sm:$0xff] }
   0xf   :  { %234 = vmatpush.bf16.msra.mxu1 %v457_v2  ;;  %v455_v5 = vld [vmem:[#allocation4 + $0x28] sm:$0xff]  ;;  %v446_v6 = vld [vmem:[#allocation2 + $0x20] sm:$0xff]  ;;  %v445_v8 = vld [vmem:[#allocation2 + $0x18] sm:$0xff] }
  0x10   :  { %v454_v7 = vld [vmem:[#allocation4 + $0x20] sm:$0xff]  ;;  %v444_v9 = vld [vmem:[#allocation2 + $0x10] sm:$0xff]  ;;  %v443_v10 = vld [vmem:[#allocation2 + $0x8] sm:$0xff] }
  0x11   :  { %v442_v11 = vld [vmem:[#allocation2] sm:$0xff]  ;;  %v453_v13 = vld [vmem:[#allocation4 + $0x18] sm:$0xff]  ;;  %v452_v14 = vld [vmem:[#allocation4 + $0x10] sm:$0xff] }
  0x12   :  { %150 = vmatpush.bf16.msra.mxu0 %v448_v1  ;;  %v441_v12 = vld [vmem:[%s622_s0] sm:$0xff]  ;;  %v451_v15 = vld [vmem:[#allocation4 + $0x8] sm:$0xff]  ;;  %v465_v17 = vld [vmem:[#allocation6 + $0x38] sm:$0xff] }
  0x13   :  { %235 = vmatpush.bf16.msra.mxu1 %v456_v3  ;;  %v450_v16 = vld [vmem:[#allocation4] sm:$0xff]  ;;  %319 = vmatpush.bf16.msra.mxu2 %v465_v17  ;;  %v464_v18 = vld [vmem:[#allocation6 + $0x30] sm:$0xff]  ;;  %v463_v19 = vld [vmem:[#allocation6 + $0x28] sm:$0xff] }
  0x14   :  { %v462_v20 = vld [vmem:[#allocation6 + $0x20] sm:$0xff]  ;;  %v461_v29 = vld [vmem:[#allocation6 + $0x18] sm:$0xff]  ;;  %v460_v30 = vld [vmem:[#allocation6 + $0x10] sm:$0xff] }
  0x15   :  { %v471_v22 = vld [vmem:[%s624_s2] ss:$0 sm:$0xff]  ;;  %v459_v31 = vld [vmem:[#allocation6 + $0x8] sm:$0xff] }
  0x16   :  { %151 = vmatpush.bf16.msra.mxu0 %v447_v4  ;;  %v458_v32 = vld [vmem:[#allocation6] sm:$0xff] }
  0x17   :  { %236 = vmatpush.bf16.msra.mxu1 %v455_v5  ;;  %320 = vmatpush.bf16.msra.mxu2 %v464_v18  ;;  %v472_v34 = vld [vmem:[%s626_s4] ss:$0 sm:$0xff] }
  0x18   :  { %v473_v41 = vld [vmem:[%s628_s6] ss:$0 sm:$0xff] }
  0x1a   :  { %152 = vmatpush.bf16.msra.mxu0 %v446_v6 }
  0x1b   :  { %237 = vmatpush.bf16.msra.mxu1 %v454_v7  ;;  %321 = vmatpush.bf16.msra.mxu2 %v463_v19 }
  0x1e   :  { %153 = vmatpush.bf16.msra.mxu0 %v445_v8 }
  0x1f   :  { %238 = vmatpush.bf16.msra.mxu1 %v453_v13  ;;  %322 = vmatpush.bf16.msra.mxu2 %v462_v20 }
  0x22   :  { %154 = vmatpush.bf16.msra.mxu0 %v444_v9 }
  0x23   :  { %239 = vmatpush.bf16.msra.mxu1 %v452_v14  ;;  %323 = vmatpush.bf16.msra.mxu2 %v461_v29 }
  0x26   :  { %155 = vmatpush.bf16.msra.mxu0 %v443_v10 }
  0x27   :  { %240 = vmatpush.bf16.msra.mxu1 %v451_v15  ;;  %324 = vmatpush.bf16.msra.mxu2 %v460_v30 }
  0x2a   :  { %156 = vmatpush.bf16.msra.mxu0 %v442_v11 }
  0x2b   :  { %241 = vmatpush.bf16.msra.mxu1 %v450_v16  ;;  %325 = vmatpush.bf16.msra.mxu2 %v459_v31 }
  0x2d   :  { %157 = vmatmul.bf16.vlgmr.msra.gmra.mxu0 %v441_v12 }
  0x2f   :  { %326 = vmatpush.bf16.msra.mxu2 %v458_v32 }
  0xaa   :  { %v158_v21 = vpop.f32.mrf.mxu0 }
  0xab   :  { %v159_v23 = vadd.f32 %v471_v22, %v158_v21 }
  0xad   :  { %v163_v26 = vmax.f32 %v159_v23, 0.0 }
  0xb2   :  { %v160_v24 = vpop.f32.mrf.mxu0 }
  0xb3   :  { %v161_v25 = vadd.f32 %v471_v22, %v160_v24 }
  0xb5   :  { %v164_v27 = vmax.f32 %v161_v25, 0.0 }
  0xb7   :  { %v165_v28 = vpack.c.bf16 %v164_v27, %v163_v26 }
  0xb9   :  { %242 = vmatmul.bf16.vlgmr.msra.gmra.mxu1 %v165_v28 }
 0x136   :  { %v243_v33 = vpop.f32.mrf.mxu1 }
 0x137   :  { %v244_v35 = vadd.f32 %v472_v34, %v243_v33 }
 0x139   :  { %v248_v38 = vmax.f32 %v244_v35, 0.0 }
 0x13e   :  { %v245_v36 = vpop.f32.mrf.mxu1 }
 0x13f   :  { %v246_v37 = vadd.f32 %v472_v34, %v245_v36 }
 0x141   :  { %v249_v39 = vmax.f32 %v246_v37, 0.0 }
 0x143   :  { %v250_v40 = vpack.c.bf16 %v249_v39, %v248_v38 }
 0x145   :  { %327 = vmatmul.bf16.vlgmr.msra.gmra.mxu2 %v250_v40 }
 0x1c8   :  { %v328_v42 = vpop.f32.mrf.mxu2 }
 0x1c9   :  { %v329_v43 = vadd.f32 %v473_v41, %v328_v42 }
 0x1cb   :  { %333 = vst [vmem:[%s629_s7] sm:$0xff] %v329_v43 }
 0x1d0   :  { %v330_v44 = vpop.f32.mrf.mxu2 }
 0x1d1   :  { %v331_v45 = vadd.f32 %v473_v41, %v330_v44 }
 0x1d3   :  { %334 = vst [vmem:[%s629_s7 + $0x8] sm:$0xff] %v331_v45 }
 0x1d4   :  { %339 = vsyncpa [#allocation3], 1 }
 0x1d5   :  { %340 = vsyncpa [#allocation5], 1 }

</bundles_post_ra>
